<compile_context>
chip_gen: v6e
topology: v6e:2x2x1
jax: 0.10.0
libtpu: 0.0.40
codegen_flags: <defaults>
</compile_context>

<pallas_src>
import functools
import math

import jax
import jax.numpy as jnp
import numpy as np
from jax.experimental import pallas as pl
from jax.experimental.pallas import tpu as pltpu


def _mtb2_kernel(x_ref, w1_ref, b1_ref, w2_ref, b2_ref, o_ref,
                 xpad_ref, y1pad_ref, *, seq_len):
    """One grid step: all channels x (nb batch elements packed along lanes)."""
    f32 = jnp.float32
    neg = jnp.finfo(f32).min
    C, L = x_ref.shape                      # L = nb * seq_len (lane-dense slab)
    GH = w1_ref.shape[0]                    # num_part * hidden_channels
    T = seq_len

    x = x_ref[...].astype(f32)              # (C, L)

    # Per-segment time index: batch elements are concatenated along the lane
    # axis with period T, so out-of-range taps at segment boundaries must be
    # masked (zero for avg/conv padding, -inf surrogate for max).
    pos = jax.lax.broadcasted_iota(jnp.int32, (C, L), 1) % T
    v_m2, v_m1 = pos >= 2, pos >= 1
    v_p1, v_p2 = pos < T - 1, pos < T - 2

    # Stage x once into a VMEM scratch with a 2-column halo on each side so
    # every time-shifted tap is a cheap static lane-offset load.  Only the
    # halo columns are written with zeros (no full-scratch zeroing); the data
    # region is fully overwritten every step.
    xpad_ref[:, 0:2] = jnp.zeros((C, 2), f32)
    xpad_ref[:, 2:2 + L] = x
    xpad_ref[:, 2 + L:4 + L] = jnp.zeros((C, 2), f32)

    t_m2 = xpad_ref[:, 0:L]
    t_m1 = xpad_ref[:, 1:1 + L]
    t_p1 = xpad_ref[:, 3:3 + L]
    t_p2 = xpad_ref[:, 4:4 + L]

    # Zero-masked taps (shared by the avg-pool and conv1's zero padding).
    z_m2 = jnp.where(v_m2, t_m2, 0.0)
    z_m1 = jnp.where(v_m1, t_m1, 0.0)
    z_p1 = jnp.where(v_p1, t_p1, 0.0)
    z_p2 = jnp.where(v_p2, t_p2, 0.0)

    # AvgPool1d(5, padding=2, stride=1), count_include_pad=True.
    avg = (z_m2 + z_m1 + x + z_p1 + z_p2) * 0.2

    # MaxPool1d(5, padding=2, stride=1): out-of-range taps act as -inf.
    # (The centre tap is always valid, so the finfo.min surrogate never leaks.)
    mx = x
    mx = jnp.maximum(mx, jnp.where(v_m2, t_m2, neg))
    mx = jnp.maximum(mx, jnp.where(v_m1, t_m1, neg))
    mx = jnp.maximum(mx, jnp.where(v_p1, t_p1, neg))
    mx = jnp.maximum(mx, jnp.where(v_p2, t_p2, neg))
    sm = avg + mx                                              # (C, L)

    # conv1 (grouped, k=3) as ONE block-diagonal MXU dot:
    #   W1bd : (GH, 3C), RHS1 : (3C, L) = [tap(-1); tap(0); tap(+1)].
    rhs1 = jnp.concatenate([z_m1, x, z_p1], axis=0)            # (3C, L)
    y1 = jnp.dot(w1_ref[...], rhs1, preferred_element_type=f32) + b1_ref[...]
    y1 = jnp.maximum(y1, 0.0)                                  # ReLU, (GH, L)

    # conv2 (grouped, k=3) as ONE block-diagonal MXU dot.
    y1pad_ref[:, 0:1] = jnp.zeros((GH, 1), f32)
    y1pad_ref[:, 1:1 + L] = y1
    y1pad_ref[:, 1 + L:2 + L] = jnp.zeros((GH, 1), f32)
    pos_h = jax.lax.broadcasted_iota(jnp.int32, (GH, L), 1) % T
    y_m1 = jnp.where(pos_h >= 1, y1pad_ref[:, 0:L], 0.0)
    y_p1 = jnp.where(pos_h < T - 1, y1pad_ref[:, 2:2 + L], 0.0)
    rhs2 = jnp.concatenate([y_m1, y1, y_p1], axis=0)           # (3GH, L)
    att = jax.nn.sigmoid(
        jnp.dot(w2_ref[...], rhs2, preferred_element_type=f32) + b2_ref[...])

    o_ref[...] = (sm * att).astype(o_ref.dtype)


def _pick_batch_tile(N, T, target_lanes=1024):
    """Batch elements packed per grid step (lane tile = nb * T).

    The lane tile must be a multiple of 128 (lane-dense, legal blocking) or
    cover the whole flattened batch (block == full array, always legal).
    """
    step = 128 // math.gcd(T, 128)            # smallest nb with (nb*T) % 128 == 0
    if N * T <= 256 or N < 2 * step:
        return N                              # single grid step over everything
    nb = (min(max(target_lanes // T, 1), N // 2) // step) * step
    return max(step, nb)


def mtb2_forward(x, w1, b1, w2, b2, *, channels, num_part, squeeze_ratio):
    """MTB2 forward. x: (N, C, T) with C = channels * num_part (PyTorch layout)."""
    N, C, T = x.shape
    G = num_part
    Cg = channels
    H = channels // squeeze_ratio
    GH = G * H
    assert C == G * Cg

    out_dtype = x.dtype
    f32 = jnp.float32

    nb = _pick_batch_tile(N, T)
    n_steps = -(-N // nb)
    Npad = n_steps * nb
    L = nb * T

    # Lane-dense layout: (N, C, T) -> (C, Npad*T); batch packed along lanes.
    if Npad != N:
        x = jnp.concatenate([x, jnp.zeros((Npad - N, C, T), x.dtype)], axis=0)
    x2d = jnp.transpose(x, (1, 0, 2)).reshape(C, Npad * T)

    # Block-diagonal weights (built once at trace time):
    #   W1bd[g*H+h, k*C + g*Cg + c]  = w1[g*H+h, c, k]
    #   W2bd[g*Cg+c, k*GH + g*H + h] = w2[g*Cg+c, h, k]
    eye = jnp.eye(G, dtype=f32)
    w1_bd = jnp.einsum('ghck,gj->ghkjc',
                       w1.astype(f32).reshape(G, H, Cg, 3), eye).reshape(GH, 3 * C)
    w2_bd = jnp.einsum('gchk,gj->gckjh',
                       w2.astype(f32).reshape(G, Cg, H, 3), eye).reshape(C, 3 * GH)
    b1_col = b1.astype(f32).reshape(GH, 1)
    b2_col = b2.astype(f32).reshape(C, 1)

    kernel = functools.partial(_mtb2_kernel, seq_len=T)

    flops = 2 * Npad * T * (GH * 3 * C + C * 3 * GH) + 16 * Npad * C * T
    bytes_accessed = (x2d.dtype.itemsize * 2 * Npad * C * T
                      + 4 * (GH * 3 * C + C * 3 * GH + GH + C))

    out2d = pl.pallas_call(
        kernel,
        out_shape=jax.ShapeDtypeStruct((C, Npad * T), out_dtype),
        grid=(n_steps,),
        in_specs=[
            pl.BlockSpec((C, L), lambda n: (0, n)),
            # Constant block index -> weights/biases DMA'd once, stay resident.
            pl.BlockSpec((GH, 3 * C), lambda n: (0, 0)),
            pl.BlockSpec((GH, 1), lambda n: (0, 0)),
            pl.BlockSpec((C, 3 * GH), lambda n: (0, 0)),
            pl.BlockSpec((C, 1), lambda n: (0, 0)),
        ],
        out_specs=pl.BlockSpec((C, L), lambda n: (0, n)),
        scratch_shapes=[
            pltpu.VMEM((C, L + 4), f32),       # x slab + 2-column halo
            pltpu.VMEM((GH, L + 2), f32),      # conv1 activations + 1-column halo
        ],
        compiler_params=pltpu.CompilerParams(
            dimension_semantics=("parallel",),
            vmem_limit_bytes=32 * 1024 * 1024),
        cost_estimate=pl.CostEstimate(
            flops=int(flops),
            transcendentals=int(Npad * C * T),
            bytes_accessed=int(bytes_accessed)),
    )(x2d, w1_bd, b1_col, w2_bd, b2_col)

    out = out2d.reshape(C, Npad, T).transpose(1, 0, 2)
    return out[:N] if Npad != N else out


def ref_forward(x, w1, b1, w2, b2, groups):
    """Pure-JAX reference replicating the PyTorch MTB2 semantics."""
    N, C, T = x.shape
    xp = jnp.pad(x, ((0, 0), (0, 0), (2, 2)))
    avg = sum(xp[:, :, d:d + T] for d in range(5)) / 5.0
    xm = jnp.pad(x, ((0, 0), (0, 0), (2, 2)),
                 constant_values=jnp.finfo(jnp.float32).min)
    mx = jnp.stack([xm[:, :, d:d + T] for d in range(5)], 0).max(0)
    sm = avg + mx

    def gconv(inp, w, b):
        Nn, Cin, Tt = inp.shape
        Cout = w.shape[0]
        cin_g, cout_g = Cin // groups, Cout // groups
        ip = jnp.pad(inp, ((0, 0), (0, 0), (1, 1)))
        outs = []
        for g in range(groups):
            xg = ip[:, g * cin_g:(g + 1) * cin_g]
            wg = w[g * cout_g:(g + 1) * cout_g]
            acc = jnp.zeros((Nn, cout_g, Tt), jnp.float32)
            for k in range(3):
                acc = acc + jnp.einsum('oc,nct->not', wg[:, :, k],
                                       xg[:, :, k:k + Tt])
            outs.append(acc + b[g * cout_g:(g + 1) * cout_g][None, :, None])
        return jnp.concatenate(outs, axis=1)

    y1 = jax.nn.relu(gconv(x, w1, b1))
    att = jax.nn.sigmoid(gconv(y1, w2, b2))
    return sm * att


if __name__ == "__main__":
    # Small shapes consistent with the module (MTB2(channels=16, num_part=4)).
    channels, num_part, squeeze_ratio = 16, 4, 4
    N, T = 2, 16
    C = channels * num_part                       # Conv1d channel count
    H = channels // squeeze_ratio                 # hidden_channels

    key = jax.random.PRNGKey(0)
    kx, k1, k2, k3, k4 = jax.random.split(key, 5)
    x = jax.random.normal(kx, (N, C, T), jnp.float32)
    # Deterministic synthetic parameters (PyTorch Conv1d weight shapes).
    w1 = jax.random.normal(k1, (H * num_part, channels, 3), jnp.float32) * 0.1
    b1 = jax.random.normal(k2, (H * num_part,), jnp.float32) * 0.1
    w2 = jax.random.normal(k3, (channels * num_part, H, 3), jnp.float32) * 0.1
    b2 = jax.random.normal(k4, (channels * num_part,), jnp.float32) * 0.1

    out = mtb2_forward(x, w1, b1, w2, b2, channels=channels,
                       num_part=num_part, squeeze_ratio=squeeze_ratio)
    out = jax.block_until_ready(out)

    ref = jax.block_until_ready(ref_forward(x, w1, b1, w2, b2, num_part))
    assert out.shape == (N, C, T)
    # f32 MXU accumulation order differs slightly from the XLA reference.
    np.testing.assert_allclose(np.asarray(out), np.asarray(ref),
                               rtol=1e-3, atol=1e-3)
    print("KERNEL_OK")
</pallas_src>

<mosaic_0001>
module attributes {stable_mosaic.version = 11 : i64} {
  func.func @_mtb2_kernel(%arg0: i32, %arg1: memref<64x32xf32, #tpu.memory_space<vmem>>, %arg2: memref<16x192xf32, #tpu.memory_space<vmem>>, %arg3: memref<16x1xf32, #tpu.memory_space<vmem>>, %arg4: memref<64x48xf32, #tpu.memory_space<vmem>>, %arg5: memref<64x1xf32, #tpu.memory_space<vmem>>, %arg6: memref<64x32xf32, #tpu.memory_space<vmem>>, %arg7: memref<64x36xf32, #tpu.memory_space<vmem>>, %arg8: memref<16x34xf32, #tpu.memory_space<vmem>>) attributes {dimension_semantics = [#tpu.dimension_semantics<parallel>], iteration_bounds = array<i64: 1>, scalar_prefetch = 0 : i64, scratch_operands = 2 : i64, tpu.core_type = #tpu.core_type<tc>, window_params = [{transform_indices = @transform_0, window_bounds = array<i64: 64, 32>}, {pipeline_mode = #tpu.pipeline_mode<synchronous>, transform_indices = @transform_1, window_bounds = array<i64: 16, 192>}, {pipeline_mode = #tpu.pipeline_mode<synchronous>, transform_indices = @transform_2, window_bounds = array<i64: 16, 1>}, {pipeline_mode = #tpu.pipeline_mode<synchronous>, transform_indices = @transform_3, window_bounds = array<i64: 64, 48>}, {pipeline_mode = #tpu.pipeline_mode<synchronous>, transform_indices = @transform_4, window_bounds = array<i64: 64, 1>}, {transform_indices = @transform_5, window_bounds = array<i64: 64, 32>}]} {
    %c0 = arith.constant 0 : index
    %c0_0 = arith.constant 0 : index
    %0 = vector.load %arg1[%c0, %c0_0] : memref<64x32xf32, #tpu.memory_space<vmem>>, vector<64x32xf32>
    %1 = tpu.iota {dimensions = array<i32: 1>} : vector<64x32xi32>
    %c16_i32 = arith.constant 16 : i32
    %c0_i32 = arith.constant 0 : i32
    %2 = arith.cmpi eq, %c16_i32, %c0_i32 : i32
    %c1_i32 = arith.constant 1 : i32
    %3 = arith.select %2, %c1_i32, %c16_i32 : i32
    %4 = vector.broadcast %3 : i32 to vector<64x32xi32>
    %5 = arith.remsi %1, %4 : vector<64x32xi32>
    %c0_i32_1 = arith.constant 0 : i32
    %6 = vector.broadcast %c0_i32_1 : i32 to vector<64x32xi32>
    %7 = arith.cmpi ne, %5, %6 : vector<64x32xi32>
    %c0_i32_2 = arith.constant 0 : i32
    %8 = vector.broadcast %c0_i32_2 : i32 to vector<64x32xi32>
    %9 = arith.cmpi slt, %5, %8 : vector<64x32xi32>
    %c0_i32_3 = arith.constant 0 : i32
    %10 = arith.cmpi slt, %3, %c0_i32_3 : i32
    %11 = vector.broadcast %10 : i1 to vector<64x32xi1>
    %12 = vector.broadcast %11 : vector<64x32xi1> to vector<64x32xi1>
    %13 = arith.xori %9, %12 : vector<64x32xi1>
    %14 = arith.andi %13, %7 : vector<64x32xi1>
    %15 = vector.broadcast %3 : i32 to vector<64x32xi32>
    %16 = arith.addi %5, %15 : vector<64x32xi32>
    %17 = arith.select %14, %16, %5 : vector<64x32xi1>, vector<64x32xi32>
    %c2_i32 = arith.constant 2 : i32
    %18 = vector.broadcast %c2_i32 : i32 to vector<64x32xi32>
    %19 = arith.cmpi sge, %17, %18 : vector<64x32xi32>
    %c1_i32_4 = arith.constant 1 : i32
    %20 = vector.broadcast %c1_i32_4 : i32 to vector<64x32xi32>
    %21 = arith.cmpi sge, %17, %20 : vector<64x32xi32>
    %c15_i32 = arith.constant 15 : i32
    %22 = vector.broadcast %c15_i32 : i32 to vector<64x32xi32>
    %23 = arith.cmpi slt, %17, %22 : vector<64x32xi32>
    %c14_i32 = arith.constant 14 : i32
    %24 = vector.broadcast %c14_i32 : i32 to vector<64x32xi32>
    %25 = arith.cmpi slt, %17, %24 : vector<64x32xi32>
    %cst = arith.constant 0.000000e+00 : f32
    %26 = vector.broadcast %cst : f32 to vector<64x2xf32>
    %c0_5 = arith.constant 0 : index
    %c0_6 = arith.constant 0 : index
    %27 = vector.load %arg7[%c0_5, %c0_6] : memref<64x36xf32, #tpu.memory_space<vmem>>, vector<64x2xf32>
    tpu.vector_store %arg7[%c0_5, %c0_6], %26 {strides = array<i32>} : memref<64x36xf32, #tpu.memory_space<vmem>>, vector<64x2xf32>,
    %c0_7 = arith.constant 0 : index
    %c2 = arith.constant 2 : index
    %28 = vector.load %arg7[%c0_7, %c2] : memref<64x36xf32, #tpu.memory_space<vmem>>, vector<64x32xf32>
    tpu.vector_store %arg7[%c0_7, %c2], %0 {strides = array<i32>} : memref<64x36xf32, #tpu.memory_space<vmem>>, vector<64x32xf32>,
    %cst_8 = arith.constant 0.000000e+00 : f32
    %29 = vector.broadcast %cst_8 : f32 to vector<64x2xf32>
    %c0_9 = arith.constant 0 : index
    %c34 = arith.constant 34 : index
    %30 = vector.load %arg7[%c0_9, %c34] : memref<64x36xf32, #tpu.memory_space<vmem>>, vector<64x2xf32>
    tpu.vector_store %arg7[%c0_9, %c34], %29 {strides = array<i32>} : memref<64x36xf32, #tpu.memory_space<vmem>>, vector<64x2xf32>,
    %c0_10 = arith.constant 0 : index
    %c0_11 = arith.constant 0 : index
    %31 = vector.load %arg7[%c0_10, %c0_11] : memref<64x36xf32, #tpu.memory_space<vmem>>, vector<64x32xf32>
    %c0_12 = arith.constant 0 : index
    %c1 = arith.constant 1 : index
    %32 = vector.load %arg7[%c0_12, %c1] : memref<64x36xf32, #tpu.memory_space<vmem>>, vector<64x32xf32>
    %c0_13 = arith.constant 0 : index
    %c3 = arith.constant 3 : index
    %33 = vector.load %arg7[%c0_13, %c3] : memref<64x36xf32, #tpu.memory_space<vmem>>, vector<64x32xf32>
    %c0_14 = arith.constant 0 : index
    %c4 = arith.constant 4 : index
    %34 = vector.load %arg7[%c0_14, %c4] : memref<64x36xf32, #tpu.memory_space<vmem>>, vector<64x32xf32>
    %cst_15 = arith.constant 0.000000e+00 : f32
    %35 = vector.broadcast %cst_15 : f32 to vector<64x32xf32>
    %36 = arith.select %19, %31, %35 : vector<64x32xi1>, vector<64x32xf32>
    %cst_16 = arith.constant 0.000000e+00 : f32
    %37 = vector.broadcast %cst_16 : f32 to vector<64x32xf32>
    %38 = arith.select %21, %32, %37 : vector<64x32xi1>, vector<64x32xf32>
    %cst_17 = arith.constant 0.000000e+00 : f32
    %39 = vector.broadcast %cst_17 : f32 to vector<64x32xf32>
    %40 = arith.select %23, %33, %39 : vector<64x32xi1>, vector<64x32xf32>
    %cst_18 = arith.constant 0.000000e+00 : f32
    %41 = vector.broadcast %cst_18 : f32 to vector<64x32xf32>
    %42 = arith.select %25, %34, %41 : vector<64x32xi1>, vector<64x32xf32>
    %43 = arith.addf %36, %38 : vector<64x32xf32>
    %44 = arith.addf %43, %0 : vector<64x32xf32>
    %45 = arith.addf %44, %40 : vector<64x32xf32>
    %46 = arith.addf %45, %42 : vector<64x32xf32>
    %cst_19 = arith.constant 2.000000e-01 : f32
    %47 = vector.broadcast %cst_19 : f32 to vector<64x32xf32>
    %48 = arith.mulf %46, %47 : vector<64x32xf32>
    %cst_20 = arith.constant -3.40282347E+38 : f32
    %49 = vector.broadcast %cst_20 : f32 to vector<64x32xf32>
    %50 = arith.select %19, %31, %49 : vector<64x32xi1>, vector<64x32xf32>
    %51 = arith.maximumf %0, %50 : vector<64x32xf32>
    %cst_21 = arith.constant -3.40282347E+38 : f32
    %52 = vector.broadcast %cst_21 : f32 to vector<64x32xf32>
    %53 = arith.select %21, %32, %52 : vector<64x32xi1>, vector<64x32xf32>
    %54 = arith.maximumf %51, %53 : vector<64x32xf32>
    %cst_22 = arith.constant -3.40282347E+38 : f32
    %55 = vector.broadcast %cst_22 : f32 to vector<64x32xf32>
    %56 = arith.select %23, %33, %55 : vector<64x32xi1>, vector<64x32xf32>
    %57 = arith.maximumf %54, %56 : vector<64x32xf32>
    %cst_23 = arith.constant -3.40282347E+38 : f32
    %58 = vector.broadcast %cst_23 : f32 to vector<64x32xf32>
    %59 = arith.select %25, %34, %58 : vector<64x32xi1>, vector<64x32xf32>
    %60 = arith.maximumf %57, %59 : vector<64x32xf32>
    %61 = arith.addf %48, %60 : vector<64x32xf32>
    %62 = tpu.concatenate %38, %0, %40 in 0 : vector<64x32xf32>, vector<64x32xf32>, vector<64x32xf32> -> vector<192x32xf32>
    %c0_24 = arith.constant 0 : index
    %c0_25 = arith.constant 0 : index
    %63 = vector.load %arg2[%c0_24, %c0_25] : memref<16x192xf32, #tpu.memory_space<vmem>>, vector<16x192xf32>
    %cst_26 = arith.constant dense<0.000000e+00> : vector<16x32xf32>
    %64 = tpu.matmul %63, %62, %cst_26 {dimension_numbers = #tpu.dot_dimension_numbers<[1], [0], [0], [1], [0, 0, 1, 1], [], []>} : vector<16x192xf32>, vector<192x32xf32>, vector<16x32xf32> -> vector<16x32xf32>
    %c0_27 = arith.constant 0 : index
    %c0_28 = arith.constant 0 : index
    %65 = vector.load %arg3[%c0_27, %c0_28] : memref<16x1xf32, #tpu.memory_space<vmem>>, vector<16x1xf32>
    %66 = vector.broadcast %65 : vector<16x1xf32> to vector<16x32xf32>
    %67 = arith.addf %64, %66 : vector<16x32xf32>
    %cst_29 = arith.constant 0.000000e+00 : f32
    %68 = vector.broadcast %cst_29 : f32 to vector<16x32xf32>
    %69 = arith.maximumf %67, %68 : vector<16x32xf32>
    %cst_30 = arith.constant 0.000000e+00 : f32
    %70 = vector.broadcast %cst_30 : f32 to vector<16x1xf32>
    %c0_31 = arith.constant 0 : index
    %c0_32 = arith.constant 0 : index
    %71 = vector.load %arg8[%c0_31, %c0_32] : memref<16x34xf32, #tpu.memory_space<vmem>>, vector<16x1xf32>
    tpu.vector_store %arg8[%c0_31, %c0_32], %70 {strides = array<i32>} : memref<16x34xf32, #tpu.memory_space<vmem>>, vector<16x1xf32>,
    %c0_33 = arith.constant 0 : index
    %c1_34 = arith.constant 1 : index
    %72 = vector.load %arg8[%c0_33, %c1_34] : memref<16x34xf32, #tpu.memory_space<vmem>>, vector<16x32xf32>
    tpu.vector_store %arg8[%c0_33, %c1_34], %69 {strides = array<i32>} : memref<16x34xf32, #tpu.memory_space<vmem>>, vector<16x32xf32>,
    %cst_35 = arith.constant 0.000000e+00 : f32
    %73 = vector.broadcast %cst_35 : f32 to vector<16x1xf32>
    %c0_36 = arith.constant 0 : index
    %c33 = arith.constant 33 : index
    %74 = vector.load %arg8[%c0_36, %c33] : memref<16x34xf32, #tpu.memory_space<vmem>>, vector<16x1xf32>
    tpu.vector_store %arg8[%c0_36, %c33], %73 {strides = array<i32>} : memref<16x34xf32, #tpu.memory_space<vmem>>, vector<16x1xf32>,
    %75 = tpu.iota {dimensions = array<i32: 1>} : vector<16x32xi32>
    %c16_i32_37 = arith.constant 16 : i32
    %c0_i32_38 = arith.constant 0 : i32
    %76 = arith.cmpi eq, %c16_i32_37, %c0_i32_38 : i32
    %c1_i32_39 = arith.constant 1 : i32
    %77 = arith.select %76, %c1_i32_39, %c16_i32_37 : i32
    %78 = vector.broadcast %77 : i32 to vector<16x32xi32>
    %79 = arith.remsi %75, %78 : vector<16x32xi32>
    %c0_i32_40 = arith.constant 0 : i32
    %80 = vector.broadcast %c0_i32_40 : i32 to vector<16x32xi32>
    %81 = arith.cmpi ne, %79, %80 : vector<16x32xi32>
    %c0_i32_41 = arith.constant 0 : i32
    %82 = vector.broadcast %c0_i32_41 : i32 to vector<16x32xi32>
    %83 = arith.cmpi slt, %79, %82 : vector<16x32xi32>
    %c0_i32_42 = arith.constant 0 : i32
    %84 = arith.cmpi slt, %77, %c0_i32_42 : i32
    %85 = vector.broadcast %84 : i1 to vector<16x32xi1>
    %86 = vector.broadcast %85 : vector<16x32xi1> to vector<16x32xi1>
    %87 = arith.xori %83, %86 : vector<16x32xi1>
    %88 = arith.andi %87, %81 : vector<16x32xi1>
    %89 = vector.broadcast %77 : i32 to vector<16x32xi32>
    %90 = arith.addi %79, %89 : vector<16x32xi32>
    %91 = arith.select %88, %90, %79 : vector<16x32xi1>, vector<16x32xi32>
    %c1_i32_43 = arith.constant 1 : i32
    %92 = vector.broadcast %c1_i32_43 : i32 to vector<16x32xi32>
    %93 = arith.cmpi sge, %91, %92 : vector<16x32xi32>
    %c0_44 = arith.constant 0 : index
    %c0_45 = arith.constant 0 : index
    %94 = vector.load %arg8[%c0_44, %c0_45] : memref<16x34xf32, #tpu.memory_space<vmem>>, vector<16x32xf32>
    %cst_46 = arith.constant 0.000000e+00 : f32
    %95 = vector.broadcast %cst_46 : f32 to vector<16x32xf32>
    %96 = arith.select %93, %94, %95 : vector<16x32xi1>, vector<16x32xf32>
    %c15_i32_47 = arith.constant 15 : i32
    %97 = vector.broadcast %c15_i32_47 : i32 to vector<16x32xi32>
    %98 = arith.cmpi slt, %91, %97 : vector<16x32xi32>
    %c0_48 = arith.constant 0 : index
    %c2_49 = arith.constant 2 : index
    %99 = vector.load %arg8[%c0_48, %c2_49] : memref<16x34xf32, #tpu.memory_space<vmem>>, vector<16x32xf32>
    %cst_50 = arith.constant 0.000000e+00 : f32
    %100 = vector.broadcast %cst_50 : f32 to vector<16x32xf32>
    %101 = arith.select %98, %99, %100 : vector<16x32xi1>, vector<16x32xf32>
    %102 = tpu.concatenate %96, %69, %101 in 0 : vector<16x32xf32>, vector<16x32xf32>, vector<16x32xf32> -> vector<48x32xf32>
    %c0_51 = arith.constant 0 : index
    %c0_52 = arith.constant 0 : index
    %103 = vector.load %arg4[%c0_51, %c0_52] : memref<64x48xf32, #tpu.memory_space<vmem>>, vector<64x48xf32>
    %cst_53 = arith.constant dense<0.000000e+00> : vector<64x32xf32>
    %104 = tpu.matmul %103, %102, %cst_53 {dimension_numbers = #tpu.dot_dimension_numbers<[1], [0], [0], [1], [0, 0, 1, 1], [], []>} : vector<64x48xf32>, vector<48x32xf32>, vector<64x32xf32> -> vector<64x32xf32>
    %c0_54 = arith.constant 0 : index
    %c0_55 = arith.constant 0 : index
    %105 = vector.load %arg5[%c0_54, %c0_55] : memref<64x1xf32, #tpu.memory_space<vmem>>, vector<64x1xf32>
    %106 = vector.broadcast %105 : vector<64x1xf32> to vector<64x32xf32>
    %107 = arith.addf %104, %106 : vector<64x32xf32>
    %108 = arith.negf %107 : vector<64x32xf32>
    %109 = math.exp %108 : vector<64x32xf32>
    %cst_56 = arith.constant 1.000000e+00 : f32
    %110 = vector.broadcast %cst_56 : f32 to vector<64x32xf32>
    %111 = arith.addf %110, %109 : vector<64x32xf32>
    %112 = arith.divf %110, %111 : vector<64x32xf32>
    %113 = arith.mulf %61, %112 : vector<64x32xf32>
    %c0_57 = arith.constant 0 : index
    %c0_58 = arith.constant 0 : index
    %114 = vector.load %arg6[%c0_57, %c0_58] : memref<64x32xf32, #tpu.memory_space<vmem>>, vector<64x32xf32>
    tpu.vector_store %arg6[%c0_57, %c0_58], %113 {strides = array<i32>} : memref<64x32xf32, #tpu.memory_space<vmem>>, vector<64x32xf32>,
    return
  }
  func.func @transform_0(%arg0: i32) -> (i32, i32) {
    %c0_i32 = arith.constant 0 : i32
    %c0_i32_0 = arith.constant 0 : i32
    return %c0_i32, %arg0 : i32, i32
  }
  func.func @transform_1(%arg0: i32) -> (i32, i32) {
    %c0_i32 = arith.constant 0 : i32
    %c0_i32_0 = arith.constant 0 : i32
    %c0_i32_1 = arith.constant 0 : i32
    return %c0_i32, %c0_i32_0 : i32, i32
  }
  func.func @transform_2(%arg0: i32) -> (i32, i32) {
    %c0_i32 = arith.constant 0 : i32
    %c0_i32_0 = arith.constant 0 : i32
    %c0_i32_1 = arith.constant 0 : i32
    return %c0_i32, %c0_i32_0 : i32, i32
  }
  func.func @transform_3(%arg0: i32) -> (i32, i32) {
    %c0_i32 = arith.constant 0 : i32
    %c0_i32_0 = arith.constant 0 : i32
    %c0_i32_1 = arith.constant 0 : i32
    return %c0_i32, %c0_i32_0 : i32, i32
  }
  func.func @transform_4(%arg0: i32) -> (i32, i32) {
    %c0_i32 = arith.constant 0 : i32
    %c0_i32_0 = arith.constant 0 : i32
    %c0_i32_1 = arith.constant 0 : i32
    return %c0_i32, %c0_i32_0 : i32, i32
  }
  func.func @transform_5(%arg0: i32) -> (i32, i32) {
    %c0_i32 = arith.constant 0 : i32
    %c0_i32_0 = arith.constant 0 : i32
    return %c0_i32, %arg0 : i32, i32
  }
}

</mosaic_0001>

<bundles_post_ra>
// kernel: tpu_custom_call.1
= control target key start
LH: loop header
LB: loop body
LE: loop exit
PB: predicated region body
PF: predicated region fallthrough
CT: control target
= control target key end

     0   :  { %vm46_vm0 = vcmask 15360   ;;  %v841_v2 = vmov 0.0   ;;  %s842_s22 = smov 2   ;;  %vm87_vm1 = vcmask 277520   ;;  %vm96_vm2 = vcmask 294160   ;;  %s844_s10 = smov 125   ;;  %s1511_s0 = inlined_call_operand.vmem [shape: f32[64,32], index: 0, kind: input, shape index: {}]   ;;  %s1512_s1 = inlined_call_operand.vmem [shape: f32[16,192], index: 1, kind: input, shape index: {}]   ;;  %s1513_s2 = inlined_call_operand.vmem [shape: f32[16,1], index: 2, kind: input, shape index: {}]   ;;  %s1514_s4 = inlined_call_operand.vmem [shape: f32[64,1], index: 4, kind: input, shape index: {}]   ;;  %s1515_s3 = inlined_call_operand.vmem [shape: f32[64,48], index: 3, kind: input, shape index: {}]   ;;  %s1516_s5 = inlined_call_operand.vmem [shape: f32[64,32], index: 5, kind: output, shape index: {}]  }
   0x1   :  { %v882_v0 = vld [vmem:[%s1511_s0 + $0x38] sm:$0xff]  ;;  %v887_v1 = vld [vmem:[%s1511_s0 + $0x28] sm:$0xff]  ;;  %54 = vst.msk [vmem:[#allocation2 + $0x38] sm:$0xff] %vm46_vm0, %v841_v2  ;;  %47 = vst.msk [vmem:[#allocation2] sm:$0xff] %vm46_vm0, %v841_v2  ;;  %360 = vmatprep.subr.mxu0 %v841_v2  ;;  %vm353_vm3 = vcmask 523264   ;;  %v845_v26 = vmov 0   ;;  %v28_v29 = vlaneseq }
   0x2   :  { %48 = vst.msk [vmem:[#allocation2 + $0x8] sm:$0xff] %vm46_vm0, %v841_v2  ;;  %49 = vst.msk [vmem:[#allocation2 + $0x10] sm:$0xff] %vm46_vm0, %v841_v2  ;;  %77 = vrot.lane.b32.xlu0 %v882_v0, %s842_s22  ;;  %73 = vrot.lane.b32.xlu1 %v887_v1, %s842_s22  ;;  %v903_v3 = vld [vmem:[%s1511_s0 + $0x30] sm:$0xff]  ;;  %v908_v4 = vld [vmem:[%s1511_s0 + $0x20] sm:$0xff]  ;;  %vm437_vm7 = vcmask 7168   ;;  %vm448_vm8 = vcmask 269320  }
   0x3   :  { %50 = vst.msk [vmem:[#allocation2 + $0x18] sm:$0xff] %vm46_vm0, %v841_v2  ;;  %51 = vst.msk [vmem:[#allocation2 + $0x20] sm:$0xff] %vm46_vm0, %v841_v2  ;;  %361 = vmatpush1.msra.mxu0 %v882_v0  ;;  %v918_v5 = vld [vmem:[%s1511_s0 + $0x18] sm:$0xff]  ;;  %v923_v6 = vld [vmem:[%s1511_s0 + $0x10] sm:$0xff]  ;;  %808 = vset.pattern.permute.xlu1 %v845_v26  ;;  %v29_v30 = vand.u32 127, %v28_v29  ;;  %vm451_vm9 = vcmask 277768  }
   0x4   :  { %52 = vst.msk [vmem:[#allocation2 + $0x28] sm:$0xff] %vm46_vm0, %v841_v2  ;;  %53 = vst.msk [vmem:[#allocation2 + $0x30] sm:$0xff] %vm46_vm0, %v841_v2  ;;  %362 = vmatprep.subr.mxu0 %v841_v2  ;;  %v933_v7 = vld [vmem:[%s1511_s0 + $0x8] sm:$0xff]  ;;  %v938_v8 = vld [vmem:[%s1511_s0] sm:$0xff]  ;;  %s843_s0 = smov 127   ;;  %807 = vset.pattern.permute.xlu0 %v845_v26  ;;  %vm524_vm10 = vcmask 392192  }
   0x5   :  { %363 = vmatpush1.msra.mxu0 %v903_v3  ;;  %v338_v25 = vld [vmem:[%s1512_s1 + $0x8] sm:$0xff]  ;;  %v341_v28 = vld [vmem:[%s1513_s2] sm:$0xff]  ;;  %v1018_v31 = vand.u32 15, %v29_v30  ;;  %438 = vst.msk [vmem:[#allocation3] sm:$0xff] %vm437_vm7, %v841_v2  ;;  %439 = vst.msk [vmem:[#allocation3 + $0x8] sm:$0xff] %vm437_vm7, %v841_v2  ;;  %s848_s15 = smov 124  }
   0x6   :  { %75 = vrot.lane.b32.xlu0 %v903_v3, %s842_s22  ;;  %71 = vrot.lane.b32.xlu1 %v908_v4, %s842_s22  ;;  %v342_v27 = vld [vmem:[%s1513_s2 + $0x8] sm:$0xff]  ;;  %vm710_vm12 = vcmask 261120  }
   0x7   :  { %364 = vmatprep.subr.mxu0 %v841_v2  ;;  %739 = vmatprep.mubr.msk.f32.mxu0 %vm353_vm3, %v338_v25  ;;  %vm43_vm4 = vcmp.ge.s32.totalorder %v1018_v31, 1  ;;  %vm42_vm5 = vcmp.ge.s32.totalorder %v1018_v31, 2  ;;  %vm44_vm6 = vcmp.lt.s32.totalorder %v1018_v31, 15  ;;  %vm45_vm11 = vcmp.lt.s32.totalorder %v1018_v31, 14 }
   0x8   :  { %365 = vmatpush1.msra.mxu0 %v887_v1 }
   0x9   :  { %366 = vmatprep.subr.mxu0 %v841_v2 }
   0xa   :  { %69 = vrot.lane.b32.xlu0 %v918_v5, %s842_s22  ;;  %67 = vrot.lane.b32.xlu1 %v923_v6, %s842_s22 }
   0xb   :  { %367 = vmatpush1.msra.mxu0 %v908_v4 }
   0xc   :  { %368 = vmatprep.subr.mxu0 %v841_v2 }
   0xd   :  { %369 = vmatpush1.msra.mxu0 %v918_v5 }
   0xe   :  { %65 = vrot.lane.b32.xlu0 %v933_v7, %s842_s22  ;;  %63 = vrot.lane.b32.xlu1 %v938_v8, %s842_s22  ;;  %s846_s22 = smov 1  }
   0xf   :  { %370 = vmatprep.subr.mxu0 %v841_v2 }
  0x10   :  { %371 = vmatpush1.msra.mxu0 %v923_v6 }
  0x11   :  { %372 = vmatprep.subr.mxu0 %v841_v2 }
  0x12   :  { %373 = vmatpush1.msra.mxu0 %v933_v7 }
  0x13   :  { %374 = vmatprep.subr.mxu0 %v841_v2 }
  0x14   :  { %375 = vmatpush1.msra.mxu0 %v938_v8 }
  0x15   :  { %376 = vmatprep.subr.mxu0 %v841_v2 }
  0x74   :  { %v78_v9 = vpop.permute.xlu0 %77  ;;  %v74_v10 = vpop.permute.xlu1 %73 }
  0x75   :  { %95 = vst.msk [vmem:[#allocation2 + $0x38] sm:$0xff] %vm87_vm1, %v78_v9  ;;  %93 = vst.msk [vmem:[#allocation2 + $0x28] sm:$0xff] %vm87_vm1, %v74_v10 }
  0x76   :  { %104 = vst.msk [vmem:[#allocation2 + $0x38] sm:$0xff] %vm96_vm2, %v841_v2  ;;  %102 = vst.msk [vmem:[#allocation2 + $0x28] sm:$0xff] %vm96_vm2, %v841_v2 }
  0x78   :  { %v76_v11 = vpop.permute.xlu0 %75  ;;  %v72_v12 = vpop.permute.xlu1 %71 }
  0x79   :  { %94 = vst.msk [vmem:[#allocation2 + $0x30] sm:$0xff] %vm87_vm1, %v76_v11  ;;  %92 = vst.msk [vmem:[#allocation2 + $0x20] sm:$0xff] %vm87_vm1, %v72_v12 }
  0x7a   :  { %103 = vst.msk [vmem:[#allocation2 + $0x30] sm:$0xff] %vm96_vm2, %v841_v2  ;;  %101 = vst.msk [vmem:[#allocation2 + $0x20] sm:$0xff] %vm96_vm2, %v841_v2 }
  0x7c   :  { %v70_v13 = vpop.permute.xlu0 %69  ;;  %v68_v14 = vpop.permute.xlu1 %67 }
  0x7d   :  { %91 = vst.msk [vmem:[#allocation2 + $0x18] sm:$0xff] %vm87_vm1, %v70_v13  ;;  %v965_v15 = vld [vmem:[#allocation2 + $0x38] sm:$0xff]  ;;  %90 = vst.msk [vmem:[#allocation2 + $0x10] sm:$0xff] %vm87_vm1, %v68_v14  ;;  %v973_v16 = vld [vmem:[#allocation2 + $0x28] sm:$0xff] }
  0x7e   :  { %100 = vst.msk [vmem:[#allocation2 + $0x18] sm:$0xff] %vm96_vm2, %v841_v2  ;;  %143 = vrot.lane.b32.xlu0 %v965_v15, %s843_s0  ;;  %99 = vst.msk [vmem:[#allocation2 + $0x10] sm:$0xff] %vm96_vm2, %v841_v2  ;;  %v272_v35 = vsel %vm42_vm5, %v965_v15, -3.4028235e+38  ;;  %v120_v38 = vsel %vm42_vm5, %v965_v15, 0.0  ;;  %v118_v43 = vsel %vm42_vm5, %v973_v16, 0.0 }
  0x7f   :  { %v270_v40 = vsel %vm42_vm5, %v973_v16, -3.4028235e+38  ;;  %v280_v42 = vmax.f32 %v882_v0, %v272_v35 }
  0x80   :  { %v66_v17 = vpop.permute.xlu0 %65  ;;  %v64_v18 = vpop.permute.xlu1 %63  ;;  %v278_v53 = vmax.f32 %v887_v1, %v270_v40 }
  0x81   :  { %89 = vst.msk [vmem:[#allocation2 + $0x8] sm:$0xff] %vm87_vm1, %v66_v17  ;;  %v976_v19 = vld [vmem:[#allocation2 + $0x30] sm:$0xff]  ;;  %88 = vst.msk [vmem:[#allocation2] sm:$0xff] %vm87_vm1, %v64_v18  ;;  %v985_v20 = vld [vmem:[#allocation2 + $0x20] sm:$0xff] }
  0x82   :  { %98 = vst.msk [vmem:[#allocation2 + $0x8] sm:$0xff] %vm96_vm2, %v841_v2  ;;  %139 = vrot.lane.b32.xlu0 %v973_v16, %s843_s0  ;;  %141 = vrot.lane.b32.xlu1 %v976_v19, %s843_s0  ;;  %97 = vst.msk [vmem:[#allocation2] sm:$0xff] %vm96_vm2, %v841_v2  ;;  %v271_v41 = vsel %vm42_vm5, %v976_v19, -3.4028235e+38  ;;  %v119_v44 = vsel %vm42_vm5, %v976_v19, 0.0  ;;  %v117_v55 = vsel %vm42_vm5, %v985_v20, 0.0 }
  0x83   :  { %v1059_v45 = vsel %vm42_vm5, %v985_v20, -3.4028235e+38  ;;  %v279_v54 = vmax.f32 %v903_v3, %v271_v41 }
  0x84   :  { %v277_v57 = vmax.f32 %v908_v4, %v1059_v45 }
  0x85   :  { %v987_v21 = vld [vmem:[#allocation2 + $0x18] sm:$0xff]  ;;  %v991_v22 = vld [vmem:[#allocation2 + $0x10] sm:$0xff] }
  0x86   :  { %135 = vrot.lane.b32.xlu0 %v987_v21, %s843_s0  ;;  %137 = vrot.lane.b32.xlu1 %v985_v20, %s843_s0  ;;  %v268_v49 = vsel %vm42_vm5, %v987_v21, -3.4028235e+38  ;;  %v116_v56 = vsel %vm42_vm5, %v987_v21, 0.0  ;;  %v115_v58 = vsel %vm42_vm5, %v991_v22, 0.0  ;;  %v1093_v59 = vsel %vm42_vm5, %v991_v22, -3.4028235e+38 }
  0x87   :  { %v276_v63 = vmax.f32 %v918_v5, %v268_v49  ;;  %v275_v18 = vmax.f32 %v923_v6, %v1093_v59 }
  0x89   :  { %v993_v23 = vld [vmem:[#allocation2 + $0x8] sm:$0xff]  ;;  %v997_v24 = vld [vmem:[#allocation2] sm:$0xff] }
  0x8a   :  { %131 = vrot.lane.b32.xlu0 %v993_v23, %s843_s0  ;;  %133 = vrot.lane.b32.xlu1 %v991_v22, %s843_s0  ;;  %v265_v49 = vsel %vm42_vm5, %v997_v24, -3.4028235e+38 }
  0x8e   :  { %175 = vrot.lane.b32.xlu0 %v965_v15, %s844_s10  ;;  %129 = vrot.lane.b32.xlu1 %v997_v24, %s843_s0 }
  0x92   :  { %171 = vrot.lane.b32.xlu0 %v973_v16, %s844_s10  ;;  %173 = vrot.lane.b32.xlu1 %v976_v19, %s844_s10 }
  0x96   :  { %167 = vrot.lane.b32.xlu0 %v987_v21, %s844_s10  ;;  %169 = vrot.lane.b32.xlu1 %v985_v20, %s844_s10 }
  0x9a   :  { %163 = vrot.lane.b32.xlu0 %v993_v23, %s844_s10  ;;  %165 = vrot.lane.b32.xlu1 %v991_v22, %s844_s10 }
  0x9e   :  { %161 = vrot.lane.b32.xlu1 %v997_v24, %s844_s10  ;;  %350 = vperm.xlu0 %807, %v342_v27  }
  0xa2   :  { %345 = vperm.xlu1 %808, %v341_v28  }
  0xf0   :  { %v144_v32 = vpop.permute.xlu0 %143 }
  0xf1   :  { %723 = vmatpush1.msk.msra.mxu0 %vm43_vm4, %v144_v32  ;;  %v160_v39 = vsel %vm43_vm4, %v144_v32, 0.0  ;;  %v288_v52 = vsel %vm43_vm4, %v144_v32, -3.4028235e+38 }
  0xf2   :  { %378 = vmatprep.subr.mxu0 %v841_v2  ;;  %v232_v46 = vadd.f32 %v160_v39, %v120_v38  ;;  %v1102_v9 = vmax.f32 %v280_v42, %v288_v52 }
  0xf4   :  { %v140_v33 = vpop.permute.xlu0 %139  ;;  %v142_v34 = vpop.permute.xlu1 %141  ;;  %v240_v14 = vadd.f32 %v232_v46, %v882_v0  ;;  %v113_v0 = vsel %vm42_vm5, %v997_v24, 0.0 }
  0xf5   :  { %724 = vmatpush1.msk.msra.mxu0 %vm43_vm4, %v142_v34  ;;  %v158_v47 = vsel %vm43_vm4, %v140_v33, 0.0  ;;  %v159_v48 = vsel %vm43_vm4, %v142_v34, 0.0  ;;  %v286_v61 = vsel %vm43_vm4, %v140_v33, -3.4028235e+38  ;;  %v287_v10 = vsel %vm43_vm4, %v142_v34, -3.4028235e+38 }
  0xf6   :  { %380 = vmatprep.subr.mxu0 %v841_v2  ;;  %v230_v60 = vadd.f32 %v158_v47, %v118_v43  ;;  %v231_v62 = vadd.f32 %v159_v48, %v119_v44  ;;  %v1125_v27 = vmax.f32 %v278_v53, %v286_v61  ;;  %v1135_v30 = vmax.f32 %v279_v54, %v287_v10 }
  0xf7   :  { %725 = vmatpush1.msk.msra.mxu0 %vm43_vm4, %v140_v33 }
  0xf8   :  { %v136_v36 = vpop.permute.xlu0 %135  ;;  %v138_v37 = vpop.permute.xlu1 %137  ;;  %382 = vmatprep.subr.mxu0 %v841_v2  ;;  %v238_v33 = vadd.f32 %v230_v60, %v887_v1  ;;  %v239_v34 = vadd.f32 %v231_v62, %v903_v3 }
  0xf9   :  { %726 = vmatpush1.msk.msra.mxu0 %vm43_vm4, %v138_v37  ;;  %v156_v11 = vsel %vm43_vm4, %v136_v36, 0.0  ;;  %v157_v17 = vsel %vm43_vm4, %v138_v37, 0.0  ;;  %v284_v35 = vsel %vm43_vm4, %v136_v36, -3.4028235e+38  ;;  %v285_v39 = vsel %vm43_vm4, %v138_v37, -3.4028235e+38 }
  0xfa   :  { %384 = vmatprep.subr.mxu0 %v841_v2  ;;  %v228_v32 = vadd.f32 %v156_v11, %v116_v56  ;;  %v229_v38 = vadd.f32 %v157_v17, %v117_v55  ;;  %v1171_v47 = vmax.f32 %v276_v63, %v284_v35  ;;  %v1173_v48 = vmax.f32 %v277_v57, %v285_v39  ;;  %v340_v39 = vld [vmem:[%s1512_s1 + $0x18] sm:$0xff] }
  0xfb   :  { %727 = vmatpush1.msk.msra.mxu0 %vm43_vm4, %v136_v36  ;;  %v273_v11 = vmax.f32 %v938_v8, %v265_v49 }
  0xfc   :  { %v1070_v50 = vpop.permute.xlu0 %131  ;;  %v134_v51 = vpop.permute.xlu1 %133  ;;  %386 = vmatprep.subr.mxu0 %v841_v2  ;;  %v236_v52 = vadd.f32 %v228_v32, %v918_v5  ;;  %v237_v57 = vadd.f32 %v229_v38, %v908_v4 }
  0xfd   :  { %728 = vmatpush1.msk.msra.mxu0 %vm43_vm4, %v134_v51  ;;  %v155_v40 = vsel %vm43_vm4, %v134_v51, 0.0  ;;  %v283_v54 = vsel %vm43_vm4, %v134_v51, -3.4028235e+38 }
  0xfe   :  { %388 = vmatprep.subr.mxu0 %v841_v2  ;;  %v227_v53 = vadd.f32 %v155_v40, %v115_v58  ;;  %v1213_v10 = vmax.f32 %v275_v18, %v283_v54 }
  0xff   :  { %729 = vmatpush1.msk.msra.mxu0 %vm43_vm4, %v1070_v50 }
 0x100   :  { %v176_v12 = vpop.permute.xlu0 %175  ;;  %v1108_v13 = vpop.permute.xlu1 %129  ;;  %390 = vmatprep.subr.mxu0 %v841_v2 }
 0x101   :  { %v192_v25 = vsel %vm44_vm6, %v176_v12, 0.0  ;;  %v1120_v26 = vsel %vm44_vm6, %v176_v12, -3.4028235e+38  ;;  %730 = vmatpush1.msk.msra.mxu0 %vm43_vm4, %v1108_v13  ;;  %v153_v55 = vsel %vm43_vm4, %v1108_v13, 0.0 }
 0x102   :  { %408 = vmatprep.subr.mxu0 %v841_v2  ;;  %v1131_v28 = vadd.f32 %v240_v14, %v192_v25  ;;  %v312_v29 = vmax.f32 %v1102_v9, %v1120_v26  ;;  %v235_v14 = vadd.f32 %v227_v53, %v923_v6  ;;  %v281_v25 = vsel %vm43_vm4, %v1108_v13, -3.4028235e+38  ;;  %v337_v13 = vld [vmem:[%s1512_s1] sm:$0xff] }
 0x103   :  { %731 = vmatpush2.msk.msra.mxu0 %vm44_vm6, %v176_v12  ;;  %v225_v12 = vadd.f32 %v153_v55, %v113_v0 }
 0x104   :  { %v172_v41 = vpop.permute.xlu0 %171  ;;  %v174_v42 = vpop.permute.xlu1 %173  ;;  %410 = vmatprep.subr.mxu0 %v841_v2 }
 0x105   :  { %v190_v43 = vsel %vm44_vm6, %v172_v41, 0.0  ;;  %v1152_v1 = vsel %vm44_vm6, %v172_v41, -3.4028235e+38  ;;  %v191_v3 = vsel %vm44_vm6, %v174_v42, 0.0  ;;  %v1158_v36 = vsel %vm44_vm6, %v174_v42, -3.4028235e+38  ;;  %732 = vmatpush2.msk.msra.mxu0 %vm44_vm6, %v174_v42 }
 0x106   :  { %v1162_v37 = vadd.f32 %v238_v33, %v190_v43  ;;  %v310_v44 = vmax.f32 %v1125_v27, %v1152_v1  ;;  %412 = vmatprep.subr.mxu0 %v841_v2  ;;  %v1167_v45 = vadd.f32 %v239_v34, %v191_v3  ;;  %v311_v46 = vmax.f32 %v1135_v30, %v1158_v36  ;;  %v339_v43 = vld [vmem:[%s1512_s1 + $0x10] sm:$0xff]  ;;  %s847_s1 = smov 126  }
 0x107   :  { %733 = vmatpush2.msk.msra.mxu0 %vm44_vm6, %v172_v41  ;;  %v1242_v34 = vmax.f32 %v273_v11, %v281_v25  ;;  %v233_v35 = vadd.f32 %v225_v12, %v938_v8 }
 0x108   :  { %v168_v56 = vpop.permute.xlu0 %167  ;;  %v170_v59 = vpop.permute.xlu1 %169  ;;  %414 = vmatprep.subr.mxu0 %v841_v2 }
 0x109   :  { %v188_v60 = vsel %vm44_vm6, %v168_v56, 0.0  ;;  %v1192_v5 = vsel %vm44_vm6, %v168_v56, -3.4028235e+38  ;;  %v189_v51 = vsel %vm44_vm6, %v170_v59, 0.0  ;;  %v1198_v58 = vsel %vm44_vm6, %v170_v59, -3.4028235e+38  ;;  %734 = vmatpush2.msk.msra.mxu0 %vm44_vm6, %v170_v59 }
 0x10a   :  { %v1202_v4 = vadd.f32 %v236_v52, %v188_v60  ;;  %v308_v61 = vmax.f32 %v1171_v47, %v1192_v5  ;;  %v1206_v62 = vadd.f32 %v237_v57, %v189_v51  ;;  %v309_v63 = vmax.f32 %v1173_v48, %v1198_v58  ;;  %416 = vmatprep.subr.mxu0 %v841_v2 }
 0x10b   :  { %735 = vmatpush2.msk.msra.mxu0 %vm44_vm6, %v168_v56 }
 0x10c   :  { %v166_v17 = vpop.permute.xlu1 %165  ;;  %418 = vmatprep.subr.mxu0 %v841_v2  ;;  %v1229_v18 = vpop.permute.xlu0 %163 }
 0x10d   :  { %v187_v32 = vsel %vm44_vm6, %v166_v17, 0.0  ;;  %v1225_v33 = vsel %vm44_vm6, %v166_v17, -3.4028235e+38  ;;  %736 = vmatpush2.msk.msra.mxu0 %vm44_vm6, %v166_v17  ;;  %v468_v17 = vld [vmem:[%s1515_s3] sm:$0xff] }
 0x10e   :  { %v1231_v6 = vadd.f32 %v235_v14, %v187_v32  ;;  %v307_v0 = vmax.f32 %v1213_v10, %v1225_v33  ;;  %420 = vmatprep.subr.mxu0 %v841_v2  ;;  %v477_v14 = vld [vmem:[%s1514_s4 + $0x8] sm:$0xff]  ;;  %787 = vmatprep.mubr.msk.f32.mxu1 %vm524_vm10, %v468_v17  ;;  %v479_v32 = vld [vmem:[%s1514_s4 + $0x18] sm:$0xff] }
 0x10f   :  { %737 = vmatpush2.msk.msra.mxu0 %vm44_vm6, %v1229_v18 }
 0x110   :  { %v162_v38 = vpop.permute.xlu1 %161  ;;  %422 = vmatprep.subr.mxu0 %v841_v2 }
 0x111   :  { %v185_v40 = vsel %vm44_vm6, %v162_v38, 0.0  ;;  %v1253_v41 = vsel %vm44_vm6, %v162_v38, -3.4028235e+38  ;;  %738 = vmatpush2.msk.msra.mxu0 %vm44_vm6, %v162_v38  ;;  %v480_v38 = vld [vmem:[%s1514_s4 + $0x20] sm:$0xff] }
 0x112   :  { %v1257_v42 = vadd.f32 %v233_v35, %v185_v40  ;;  %v305_v8 = vmax.f32 %v1242_v34, %v1253_v41  ;;  %425 = vmatmul.mubr.f32.vlgmr.msra.gmra.mxu0 %v337_v13  ;;  %v478_v13 = vld [vmem:[%s1514_s4 + $0x10] sm:$0xff]  ;;  %v481_v35 = vld [vmem:[%s1514_s4 + $0x28] sm:$0xff] }
 0x113   :  { %740 = vmatprep.mubr.msk.f32.mxu0 %vm353_vm3, %v340_v39  ;;  %v483_v39 = vld [vmem:[%s1514_s4 + $0x38] sm:$0xff]  ;;  %v482_v40 = vld [vmem:[%s1514_s4 + $0x30] sm:$0xff] }
 0x116   :  { %430 = vmatmul.mubr.f32.gmra.mxu0 %v339_v43 }
 0x119   :  { %v351_v54 = vpop.permute.xlu0 %350 }
 0x11d   :  { %v346_v3 = vpop.permute.xlu1 %345 }
 0x1d2   :  { %v426_v49 = vpop.f32.mrf.mxu0 }
 0x1d3   :  { %v427_v52 = vadd.f32 %v426_v49, %v346_v3 }
 0x1d4   :  { %v428_v53 = vpop.f32.mrf.mxu0 }
 0x1d5   :  { %v435_v55 = vmax.f32 %v427_v52, 0.0  ;;  %v473_v53 = vld [vmem:[%s1515_s3 + $0x28] sm:$0xff] }
 0x1d6   :  { %v431_v56 = vpop.f32.mrf.mxu0 }
 0x1d7   :  { %v432_v57 = vadd.f32 %v431_v56, %v351_v54  ;;  %442 = vrot.lane.b32.xlu0 %v435_v55, %s846_s22  ;;  %v474_v54 = vld [vmem:[%s1515_s3 + $0x30] sm:$0xff] }
 0x1d8   :  { %v433_v59 = vpop.f32.mrf.mxu0 }
 0x1d9   :  { %v436_v60 = vmax.f32 %v432_v57, 0.0  ;;  %v475_v57 = vld [vmem:[%s1515_s3 + $0x38] sm:$0xff] }
 0x1db   :  { %444 = vrot.lane.b32.xlu1 %v436_v60, %s846_s22 }
 0x249   :  { %v443_v51 = vpop.permute.xlu0 %442 }
 0x24a   :  { %449 = vst.msk [vmem:[#allocation3] sm:$0xff] %vm448_vm8, %v443_v51 }
 0x24b   :  { %452 = vst.msk [vmem:[#allocation3] sm:$0xff] %vm451_vm9, %v841_v2 }
 0x24d   :  { %v445_v11 = vpop.permute.xlu1 %444 }
 0x24e   :  { %450 = vst.msk [vmem:[#allocation3 + $0x8] sm:$0xff] %vm448_vm8, %v445_v11 }
 0x24f   :  { %453 = vst.msk [vmem:[#allocation3 + $0x8] sm:$0xff] %vm451_vm9, %v841_v2  ;;  %v476_v2 = vld [vmem:[%s1514_s4] sm:$0xff] }
 0x252   :  { %v454_v12 = vld [vmem:[#allocation3] sm:$0xff] }
 0x253   :  { %460 = vrot.lane.b32.xlu0 %v454_v12, %s847_s1 }
 0x256   :  { %v455_v25 = vld [vmem:[#allocation3 + $0x8] sm:$0xff] }
 0x257   :  { %462 = vrot.lane.b32.xlu1 %v455_v25, %s847_s1  ;;  %491 = vperm.xlu0 %807, %v477_v14  }
 0x25b   :  { %486 = vperm.xlu1 %808, %v476_v2   ;;  %501 = vperm.xlu0 %807, %v479_v32  }
 0x25f   :  { %496 = vperm.xlu1 %808, %v478_v13   ;;  %511 = vperm.xlu0 %807, %v481_v35  }
 0x263   :  { %506 = vperm.xlu1 %808, %v480_v38   ;;  %521 = vperm.xlu0 %807, %v483_v39  }
 0x267   :  { %516 = vperm.xlu1 %808, %v482_v40   ;;  %195 = vrot.lane.b32.xlu0 %v993_v23, %s848_s15 }
 0x26b   :  { %193 = vrot.lane.b32.xlu1 %v997_v24, %s848_s15  ;;  %199 = vrot.lane.b32.xlu0 %v987_v21, %s848_s15  ;;  %v472_v24 = vld [vmem:[%s1515_s3 + $0x20] sm:$0xff] }
 0x26f   :  { %197 = vrot.lane.b32.xlu1 %v991_v22, %s848_s15  ;;  %203 = vrot.lane.b32.xlu0 %v973_v16, %s848_s15  ;;  %v469_v16 = vld [vmem:[%s1515_s3 + $0x8] sm:$0xff]  ;;  %v471_v22 = vld [vmem:[%s1515_s3 + $0x18] sm:$0xff] }
 0x273   :  { %201 = vrot.lane.b32.xlu1 %v985_v20, %s848_s15  ;;  %207 = vrot.lane.b32.xlu0 %v965_v15, %s848_s15 }
 0x277   :  { %205 = vrot.lane.b32.xlu1 %v976_v19, %s848_s15  ;;  %v470_v19 = vld [vmem:[%s1515_s3 + $0x10] sm:$0xff] }
 0x2c5   :  { %v461_v3 = vpop.permute.xlu0 %460 }
 0x2c9   :  { %v463_v43 = vpop.permute.xlu1 %462 }
 0x2ca   :  { %775 = vmatprep.subr.msk.mxu1 %vm44_vm6, %v463_v43 }
 0x2cb   :  { %776 = vmatpush3.msk.msra.mxu1 %vm44_vm6, %v463_v43 }
 0x2cc   :  { %777 = vmatprep.subr.msk.mxu1 %vm44_vm6, %v461_v3 }
 0x2cd   :  { %778 = vmatpush3.msk.msra.mxu1 %vm44_vm6, %v461_v3 }
 0x2ce   :  { %779 = vmatprep.subr.mxu1 %v436_v60 }
 0x2cf   :  { %780 = vmatpush3.msra.mxu1 %v436_v60 }
 0x2d0   :  { %781 = vmatprep.subr.mxu1 %v435_v55 }
 0x2d1   :  { %782 = vmatpush3.msra.mxu1 %v435_v55 }
 0x2d2   :  { %783 = vmatprep.subr.msk.mxu1 %vm43_vm4, %v455_v25  ;;  %v1315_v15 = vpop.permute.xlu0 %491 }
 0x2d3   :  { %784 = vmatpush3.msk.msra.mxu1 %vm43_vm4, %v455_v25 }
 0x2d4   :  { %785 = vmatprep.subr.msk.mxu1 %vm43_vm4, %v454_v12 }
 0x2d5   :  { %786 = vmatpush3.msk.msra.mxu1 %vm43_vm4, %v454_v12 }
 0x2d6   :  { %v1329_v20 = vpop.permute.xlu1 %486  ;;  %788 = vmatmul.mubr.msk.f32.vlgmr.msra.gmra.mxu1 %vm524_vm10, %v469_v16  ;;  %v1332_v21 = vpop.permute.xlu0 %501 }
 0x2d7   :  { %790 = vmatprep.mubr.msk.f32.mxu1 %vm524_vm10, %v470_v19 }
 0x2da   :  { %v1341_v49 = vpop.permute.xlu1 %496  ;;  %791 = vmatmul.mubr.msk.f32.gmra.mxu1 %vm524_vm10, %v471_v22  ;;  %v1344_v52 = vpop.permute.xlu0 %511 }
 0x2db   :  { %793 = vmatprep.mubr.msk.f32.mxu1 %vm524_vm10, %v472_v24 }
 0x2de   :  { %v1353_v55 = vpop.permute.xlu1 %506  ;;  %794 = vmatmul.mubr.msk.f32.gmra.mxu1 %vm524_vm10, %v473_v53  ;;  %v1356_v56 = vpop.permute.xlu0 %521 }
 0x2df   :  { %796 = vmatprep.mubr.msk.f32.mxu1 %vm524_vm10, %v474_v54 }
 0x2e2   :  { %v1362_v59 = vpop.permute.xlu1 %516  ;;  %797 = vmatmul.mubr.msk.f32.gmra.mxu1 %vm524_vm10, %v475_v57  ;;  %v1365_v60 = vpop.permute.xlu0 %195 }
 0x2e6   :  { %v194_v51 = vpop.permute.xlu1 %193  ;;  %v200_v11 = vpop.permute.xlu0 %199 }
 0x2e7   :  { %v217_v12 = vsel %vm45_vm11, %v194_v51, 0.0  ;;  %v313_v14 = vsel %vm45_vm11, %v194_v51, -3.4028235e+38  ;;  %v220_v17 = vsel %vm45_vm11, %v200_v11, 0.0  ;;  %v316_v25 = vsel %vm45_vm11, %v200_v11, -3.4028235e+38 }
 0x2e8   :  { %v249_v2 = vadd.f32 %v1257_v42, %v217_v12  ;;  %v252_v32 = vadd.f32 %v1202_v4, %v220_v17  ;;  %v321_v35 = vmax.f32 %v305_v8, %v313_v14  ;;  %v324_v39 = vmax.f32 %v308_v61, %v316_v25 }
 0x2ea   :  { %v257_v13 = vmul.f32 0.2, %v249_v2  ;;  %v260_v38 = vmul.f32 0.2, %v252_v32  ;;  %v198_v40 = vpop.permute.xlu1 %197  ;;  %v204_v43 = vpop.permute.xlu0 %203 }
 0x2eb   :  { %v219_v3 = vsel %vm45_vm11, %v198_v40, 0.0  ;;  %v315_v42 = vsel %vm45_vm11, %v198_v40, -3.4028235e+38  ;;  %v222_v4 = vsel %vm45_vm11, %v204_v43, 0.0  ;;  %v318_v34 = vsel %vm45_vm11, %v204_v43, -3.4028235e+38 }
 0x2ec   :  { %v1392_v41 = vadd.f32 %v321_v35, %v257_v13  ;;  %v1394_v8 = vadd.f32 %v324_v39, %v260_v38  ;;  %v251_v47 = vadd.f32 %v1231_v6, %v219_v3  ;;  %v254_v5 = vadd.f32 %v1162_v37, %v222_v4 }
 0x2ed   :  { %v323_v16 = vmax.f32 %v307_v0, %v315_v42  ;;  %v326_v19 = vmax.f32 %v310_v44, %v318_v34  ;;  %v114_v4 = vsel %vm42_vm5, %v993_v23, 0.0 }
 0x2ee   :  { %v259_v61 = vmul.f32 0.2, %v251_v47  ;;  %v202_v22 = vpop.permute.xlu1 %201  ;;  %v208_v24 = vpop.permute.xlu0 %207  ;;  %v262_v53 = vmul.f32 0.2, %v254_v5 }
 0x2ef   :  { %v221_v54 = vsel %vm45_vm11, %v202_v22, 0.0  ;;  %v317_v6 = vsel %vm45_vm11, %v202_v22, -3.4028235e+38  ;;  %v224_v37 = vsel %vm45_vm11, %v208_v24, 0.0  ;;  %v320_v1 = vsel %vm45_vm11, %v208_v24, -3.4028235e+38 }
 0x2f0   :  { %v1410_v57 = vadd.f32 %v323_v16, %v259_v61  ;;  %v253_v10 = vadd.f32 %v1206_v62, %v221_v54  ;;  %v256_v33 = vadd.f32 %v1131_v28, %v224_v37  ;;  %v1414_v27 = vadd.f32 %v326_v19, %v262_v53 }
 0x2f1   :  { %v325_v0 = vmax.f32 %v309_v63, %v317_v6  ;;  %v328_v11 = vmax.f32 %v312_v29, %v320_v1  ;;  %v266_v19 = vsel %vm42_vm5, %v993_v23, -3.4028235e+38  ;;  %v186_v22 = vsel %vm44_vm6, %v1229_v18, 0.0 }
 0x2f2   :  { %v261_v44 = vmul.f32 0.2, %v253_v10  ;;  %v264_v51 = vmul.f32 0.2, %v256_v33  ;;  %v206_v12 = vpop.permute.xlu1 %205  ;;  %v218_v54 = vsel %vm45_vm11, %v1365_v60, 0.0  ;;  %v274_v6 = vmax.f32 %v933_v7, %v266_v19 }
 0x2f3   :  { %v223_v62 = vsel %vm45_vm11, %v206_v12, 0.0  ;;  %v319_v28 = vsel %vm45_vm11, %v206_v12, -3.4028235e+38  ;;  %v282_v23 = vsel %vm43_vm4, %v1070_v50, -3.4028235e+38 }
 0x2f4   :  { %v1428_v14 = vadd.f32 %v325_v0, %v261_v44  ;;  %v1430_v17 = vadd.f32 %v328_v11, %v264_v51  ;;  %v255_v25 = vadd.f32 %v1167_v45, %v223_v62  ;;  %v327_v58 = vmax.f32 %v311_v46, %v319_v28 }
 0x2f5   :  { %v298_v51 = vsel %vm44_vm6, %v1229_v18, -3.4028235e+38  ;;  %v290_v11 = vmax.f32 %v274_v6, %v282_v23  ;;  %v314_v62 = vsel %vm45_vm11, %v1365_v60, -3.4028235e+38 }
 0x2f6   :  { %v263_v48 = vmul.f32 0.2, %v255_v25 }
 0x2f7   :  { %v306_v28 = vmax.f32 %v290_v11, %v298_v51 }
 0x2f8   :  { %v1436_v9 = vadd.f32 %v327_v58, %v263_v48 }
 0x2f9   :  { %v322_v58 = vmax.f32 %v306_v28, %v314_v62 }
 0x396   :  { %v789_v26 = vpop.f32.mrf.mxu1 }
 0x397   :  { %v621_v29 = vadd.f32 %v789_v26, %v1315_v15 }
 0x398   :  { %v615_v63 = vpop.f32.mrf.mxu1 }
 0x399   :  { %v754_v2 = vmul.f32 -1.442695, %v621_v29  ;;  %v616_v32 = vadd.f32 %v615_v63, %v1329_v20 }
 0x39a   :  { %v792_v13 = vpop.f32.mrf.mxu1 }
 0x39b   :  { %809 = vpow2.f32 %v754_v2  ;;  %v753_v35 = vmul.f32 -1.442695, %v616_v32  ;;  %v631_v38 = vadd.f32 %v792_v13, %v1332_v21 }
 0x39c   :  { %v625_v45 = vpop.f32.mrf.mxu1 }
 0x39d   :  { %811 = vpow2.f32 %v753_v35  ;;  %v756_v39 = vmul.f32 -1.442695, %v631_v38  ;;  %v626_v30 = vadd.f32 %v625_v45, %v1341_v49  ;;  %v154_v49 = vsel %vm43_vm4, %v1070_v50, 0.0 }
 0x39e   :  { %v795_v36 = vpop.f32.mrf.mxu1  ;;  %v226_v5 = vadd.f32 %v154_v49, %v114_v4 }
 0x39f   :  { %813 = vpow2.f32 %v756_v39  ;;  %v755_v46 = vmul.f32 -1.442695, %v626_v30  ;;  %v641_v40 = vadd.f32 %v795_v36, %v1344_v52 }
 0x3a0   :  { %v635_v15 = vpop.f32.mrf.mxu1  ;;  %v234_v24 = vadd.f32 %v226_v5, %v933_v7 }
 0x3a1   :  { %815 = vpow2.f32 %v755_v46  ;;  %v758_v43 = vmul.f32 -1.442695, %v641_v40  ;;  %v636_v20 = vadd.f32 %v635_v15, %v1353_v55 }
 0x3a2   :  { %v798_v3 = vpop.f32.mrf.mxu1  ;;  %v242_v37 = vadd.f32 %v234_v24, %v186_v22 }
 0x3a3   :  { %817 = vpow2.f32 %v758_v43  ;;  %v757_v42 = vmul.f32 -1.442695, %v636_v20  ;;  %v651_v21 = vadd.f32 %v798_v3, %v1356_v56 }
 0x3a4   :  { %v645_v34 = vpop.f32.mrf.mxu1  ;;  %v250_v1 = vadd.f32 %v242_v37, %v218_v54 }
 0x3a5   :  { %819 = vpow2.f32 %v757_v42  ;;  %v760_v52 = vmul.f32 -1.442695, %v651_v21  ;;  %v646_v47 = vadd.f32 %v645_v34, %v1362_v59 }
 0x3a6   :  { %v258_v25 = vmul.f32 0.2, %v250_v1 }
 0x3a7   :  { %821 = vpow2.f32 %v760_v52  ;;  %v759_v55 = vmul.f32 -1.442695, %v646_v47 }
 0x3a8   :  { %v810_v61 = vpop.eup %809  ;;  %v330_v63 = vadd.f32 %v322_v58, %v258_v25 }
 0x3a9   :  { %v679_v16 = vadd.f32 1.0, %v810_v61  ;;  %823 = vpow2.f32 %v759_v55 }
 0x3aa   :  { %v812_v56 = vpop.eup %811 }
 0x3ab   :  { %825 = vrcp.f32 %v679_v16  ;;  %v678_v53 = vadd.f32 1.0, %v812_v56 }
 0x3ac   :  { %v814_v59 = vpop.eup %813 }
 0x3ad   :  { %827 = vrcp.f32 %v678_v53  ;;  %v681_v10 = vadd.f32 1.0, %v814_v59 }
 0x3ae   :  { %v816_v33 = vpop.eup %815 }
 0x3af   :  { %829 = vrcp.f32 %v681_v10  ;;  %v680_v44 = vadd.f32 1.0, %v816_v33 }
 0x3b0   :  { %v818_v0 = vpop.eup %817 }
 0x3b1   :  { %831 = vrcp.f32 %v680_v44  ;;  %v683_v12 = vadd.f32 1.0, %v818_v0 }
 0x3b2   :  { %v820_v7 = vpop.eup %819 }
 0x3b3   :  { %833 = vrcp.f32 %v683_v12  ;;  %v682_v50 = vadd.f32 1.0, %v820_v7 }
 0x3b4   :  { %v822_v48 = vpop.eup %821 }
 0x3b5   :  { %835 = vrcp.f32 %v682_v50  ;;  %v685_v26 = vadd.f32 1.0, %v822_v48 }
 0x3b6   :  { %v824_v29 = vpop.eup %823 }
 0x3b7   :  { %837 = vrcp.f32 %v685_v26  ;;  %v684_v18 = vadd.f32 1.0, %v824_v29 }
 0x3b8   :  { %v826_v2 = vpop.eup %825 }
 0x3b9   :  { %v703_v32 = vmul.f32 %v826_v2, %v330_v63  ;;  %839 = vrcp.f32 %v684_v18 }
 0x3ba   :  { %v828_v13 = vpop.eup %827 }
 0x3bb   :  { %712 = vst.msk [vmem:[%s1516_s5 + $0x8] sm:$0xff] %vm710_vm12, %v703_v32  ;;  %v702_v31 = vmul.f32 %v828_v13, %v1392_v41 }
 0x3bc   :  { %v830_v60 = vpop.eup %829 }
 0x3bd   :  { %711 = vst.msk [vmem:[%s1516_s5] sm:$0xff] %vm710_vm12, %v702_v31  ;;  %v705_v35 = vmul.f32 %v830_v60, %v1394_v8 }
 0x3be   :  { %v832_v38 = vpop.eup %831 }
 0x3bf   :  { %714 = vst.msk [vmem:[%s1516_s5 + $0x18] sm:$0xff] %vm710_vm12, %v705_v35  ;;  %v704_v45 = vmul.f32 %v832_v38, %v1410_v57 }
 0x3c0   :  { %v834_v39 = vpop.eup %833 }
 0x3c1   :  { %713 = vst.msk [vmem:[%s1516_s5 + $0x10] sm:$0xff] %vm710_vm12, %v704_v45  ;;  %v707_v41 = vmul.f32 %v834_v39, %v1414_v27 }
 0x3c2   :  { %v836_v30 = vpop.eup %835 }
 0x3c3   :  { %716 = vst.msk [vmem:[%s1516_s5 + $0x28] sm:$0xff] %vm710_vm12, %v707_v41  ;;  %v706_v8 = vmul.f32 %v836_v30, %v1428_v14 }
 0x3c4   :  { %v838_v36 = vpop.eup %837 }
 0x3c5   :  { %715 = vst.msk [vmem:[%s1516_s5 + $0x20] sm:$0xff] %vm710_vm12, %v706_v8  ;;  %v709_v57 = vmul.f32 %v838_v36, %v1430_v17 }
 0x3c6   :  { %v840_v46 = vpop.eup %839 }
 0x3c7   :  { %718 = vst.msk [vmem:[%s1516_s5 + $0x38] sm:$0xff] %vm710_vm12, %v709_v57  ;;  %v708_v27 = vmul.f32 %v840_v46, %v1436_v9 }
 0x3c9   :  { %717 = vst.msk [vmem:[%s1516_s5 + $0x30] sm:$0xff] %vm710_vm12, %v708_v27 }

</bundles_post_ra>
